<compile_context>
chip_gen: v7x
topology: tpu7x:2x2x1
jax: 0.10.0
libtpu: 0.0.40
codegen_flags: <defaults>
</compile_context>

<pallas_src>
import jax
import jax.numpy as jnp
from jax.experimental import pallas as pl
from jax.experimental.pallas import tpu as pltpu


# ----------------------------------------------------------------------------
# Parameter setup (plain JAX glue): replicate torchaudio's create_fb_matrix
# (HTK mel scale, triangular filters) and the pseudo-inverse buffer.
# ----------------------------------------------------------------------------
def create_fb_matrix(n_freqs, f_min, f_max, n_mels, sample_rate):
    all_freqs = jnp.linspace(0.0, sample_rate // 2, n_freqs)
    m_min = 2595.0 * jnp.log10(1.0 + f_min / 700.0)
    m_max = 2595.0 * jnp.log10(1.0 + f_max / 700.0)
    m_pts = jnp.linspace(m_min, m_max, n_mels + 2)
    f_pts = 700.0 * (10.0 ** (m_pts / 2595.0) - 1.0)
    f_diff = f_pts[1:] - f_pts[:-1]                        # (n_mels + 1,)
    slopes = f_pts[None, :] - all_freqs[:, None]           # (n_freqs, n_mels + 2)
    down_slopes = (-1.0 * slopes[:, :-2]) / f_diff[:-1]    # (n_freqs, n_mels)
    up_slopes = slopes[:, 2:] / f_diff[1:]                 # (n_freqs, n_mels)
    fb = jnp.maximum(0.0, jnp.minimum(down_slopes, up_slopes))
    return fb.astype(jnp.float32)                          # (n_stft, n_mels)


def make_inverse_mel_params(n_stft, n_mels=128, sample_rate=16000,
                            f_min=0.0, f_max=None, compute_dtype=jnp.float32):
    """Returns (fb, fb_plus) with fb_plus already in kernel-ready dtype."""
    f_max = f_max or float(sample_rate // 2)
    assert f_min <= f_max
    fb = create_fb_matrix(n_stft, f_min, f_max, n_mels, sample_rate)
    # fb.transpose(0, 1).pinverse()  ->  (n_stft, n_mels)
    # TODO(synk): pinverse has no Pallas equivalent; computed once with XLA.
    fb_plus = jnp.linalg.pinv(fb.T).astype(compute_dtype)
    return fb, fb_plus


def _round_up(x, m):
    return (x + m - 1) // m * m


# ----------------------------------------------------------------------------
# Pallas kernel: one (n_stft, n_mels) x (n_mels, tT) MXU matmul per grid step.
# ----------------------------------------------------------------------------
def _inverse_mel_kernel(fbp_ref, mel_ref, out_ref):
    # fbp_ref : (n_stft, n_mels)  -- resident across the whole grid
    # mel_ref : (n_mels, tT)      -- current (batch, time-tile) block
    # out_ref : (n_stft, tT)
    # Cast (if any) happens in VMEM -> no extra HBM pass for reduced precision.
    mel = mel_ref[...].astype(fbp_ref.dtype)
    out_ref[...] = jnp.dot(
        fbp_ref[...], mel,
        preferred_element_type=jnp.float32,
    ).astype(out_ref.dtype)


def _choose_time_tile(N, B, n_stft, n_mels, in_bytes, out_bytes, time_tile):
    """Pick a lane-dense time tile and derive the per-call VMEM budget."""
    # Start from the requested tile (multiple of 128 lanes).
    tT = max(128, _round_up(min(time_tile, N), 128))
    # Balance tiles across the grid to reduce tail waste (N just over k*tT).
    n_tiles = pl.cdiv(N, tT)
    tT = max(128, _round_up(pl.cdiv(N, n_tiles), 128))
    # Guarantee enough grid steps for megacore sharding (v7x) + pipelining.
    min_steps = 8
    if B * pl.cdiv(N, tT) < min_steps:
        want_tiles = max(1, min_steps // max(B, 1))
        tT = max(128, _round_up(pl.cdiv(N, want_tiles), 128))

    def vmem_bytes(t):
        # Double-buffered mel + out blocks, plus (conservatively 2x) fb_plus.
        return (2 * t * (n_stft * out_bytes + n_mels * in_bytes)
                + 2 * n_stft * n_mels * in_bytes)

    # Cap the per-step VMEM so every generation (v5e/v6e/v7x) is comfortable.
    vmem_cap = 24 * 1024 * 1024
    while tT > 128 and vmem_bytes(tT) > vmem_cap:
        tT -= 128
    needed = vmem_bytes(tT)
    # Explicit scoped-VMEM limit: above v5e's 16 MiB default, within v7x's
    # 64 MiB physical VMEM.
    limit = min(48 * 1024 * 1024, max(needed + 8 * 1024 * 1024, 32 * 1024 * 1024))
    return tT, limit


def _matmul_call(fbp, mel, tT, out_dtype, vmem_limit_bytes):
    """fbp: (n_stft, n_mels), mel: (B, n_mels, T) -- no padding anywhere."""
    B, n_mels, T = mel.shape
    n_stft = fbp.shape[0]
    num_t = pl.cdiv(T, tT)

    cost = pl.CostEstimate(
        flops=2 * B * n_stft * n_mels * T,
        transcendentals=0,
        bytes_accessed=int(mel.size * mel.dtype.itemsize
                           + fbp.size * fbp.dtype.itemsize
                           + B * n_stft * T * jnp.dtype(out_dtype).itemsize),
    )

    return pl.pallas_call(
        _inverse_mel_kernel,
        out_shape=jax.ShapeDtypeStruct((B, n_stft, T), out_dtype),
        grid_spec=pltpu.PrefetchScalarGridSpec(
            num_scalar_prefetch=0,
            grid=(B, num_t),
            in_specs=[
                # fb_plus: full matrix (full-dim block -> no (8,128) rule),
                # resident in VMEM for the whole grid.
                pl.BlockSpec((n_stft, n_mels), lambda b, t: (0, 0)),
                # melspec: one (n_mels, tT) slab per step, batch dim squeezed.
                pl.BlockSpec((None, n_mels, tT), lambda b, t: (b, 0, t)),
            ],
            # Ragged last block: OOB writes are clipped -> no post-kernel slice.
            out_specs=pl.BlockSpec((None, n_stft, tT), lambda b, t: (b, 0, t)),
        ),
        compiler_params=pltpu.CompilerParams(
            dimension_semantics=("parallel", "parallel"),
            vmem_limit_bytes=int(vmem_limit_bytes)),
        cost_estimate=cost,
    )(fbp, mel)


# ----------------------------------------------------------------------------
# Public wrapper: matches torch.matmul(fb_plus, melspec) broadcasting semantics.
# ----------------------------------------------------------------------------
def inverse_mel_scale(fb_plus, melspec, *,
                      compute_dtype=jnp.float32,   # bf16 is opt-in (lossy)
                      out_dtype=None,              # default: melspec.dtype
                      time_tile=2048):
    """melspec: (..., n_mels, T) -> (..., n_stft, T)."""
    orig_shape = melspec.shape
    n_mels, T = orig_shape[-2], orig_shape[-1]
    n_stft = fb_plus.shape[0]
    out_dtype = out_dtype or melspec.dtype

    batch_shape = orig_shape[:-2]
    B = 1
    for d in batch_shape:
        B *= int(d)
    mel = melspec.reshape(B, n_mels, T)

    # fb_plus is tiny; cast (usually a no-op if precomputed in compute_dtype).
    fbp = fb_plus.astype(compute_dtype)

    in_bytes = mel.dtype.itemsize
    out_bytes = jnp.dtype(out_dtype).itemsize
    tT, vmem_limit = _choose_time_tile(T, B, n_stft, n_mels,
                                       in_bytes, out_bytes, time_tile)

    out = _matmul_call(fbp, mel, tT, out_dtype, vmem_limit)
    return out.reshape(*batch_shape, n_stft, T)


if __name__ == "__main__":
    # Small, deterministic configuration.
    n_stft = 65          # e.g. n_fft = 128
    n_mels = 32
    sample_rate = 16000

    fb, fb_plus = make_inverse_mel_params(n_stft, n_mels, sample_rate)
    key = jax.random.PRNGKey(0)
    k1, k2 = jax.random.split(key)

    # --- Case 1: small T (ragged, lane-masked single block) -----------------
    B, T = 2, 16
    melspec = jax.random.uniform(k1, (B, n_mels, T), dtype=jnp.float32)
    ref = jnp.einsum("fm,bmt->bft", fb_plus, melspec)

    out_f32 = jax.block_until_ready(inverse_mel_scale(fb_plus, melspec))
    assert out_f32.shape == (B, n_stft, T)
    assert jnp.allclose(out_f32, ref, atol=1e-5, rtol=1e-5)

    # Opt-in bf16 compute: looser tolerance (single rounding of the inputs).
    out_bf16 = jax.block_until_ready(
        inverse_mel_scale(fb_plus, melspec, compute_dtype=jnp.bfloat16))
    assert out_bf16.shape == (B, n_stft, T)
    assert jnp.allclose(out_bf16, ref, atol=1e-1, rtol=5e-2)

    # --- Case 2: non-multiple-of-128 T (multi-tile grid, ragged last tile) --
    B2, T2 = 2, 300
    melspec2 = jax.random.uniform(k2, (B2, n_mels, T2), dtype=jnp.float32)
    ref2 = jnp.einsum("fm,bmt->bft", fb_plus, melspec2)
    out2 = jax.block_until_ready(inverse_mel_scale(fb_plus, melspec2))
    assert out2.shape == (B2, n_stft, T2)
    assert jnp.allclose(out2, ref2, atol=1e-5, rtol=1e-5)

    # --- Case 3: no batch dims (2-D input, matmul broadcasting) -------------
    melspec3 = melspec2[0]
    ref3 = fb_plus @ melspec3
    out3 = jax.block_until_ready(inverse_mel_scale(fb_plus, melspec3))
    assert out3.shape == (n_stft, T2)
    assert jnp.allclose(out3, ref3, atol=1e-5, rtol=1e-5)

    print("KERNEL_OK")
</pallas_src>

<mosaic_0001>
module attributes {stable_mosaic.version = 11 : i64} {
  func.func @_inverse_mel_kernel(%arg0: i32, %arg1: i32, %arg2: memref<65x32xf32, #tpu.memory_space<vmem>>, %arg3: memref<1x32x128xf32, #tpu.memory_space<vmem>>, %arg4: memref<1x65x128xf32, #tpu.memory_space<vmem>>) attributes {dimension_semantics = [#tpu.dimension_semantics<parallel>, #tpu.dimension_semantics<parallel>], iteration_bounds = array<i64: 2, 1>, scalar_prefetch = 0 : i64, scratch_operands = 0 : i64, tpu.core_type = #tpu.core_type<tc>, window_params = [{pipeline_mode = #tpu.pipeline_mode<synchronous>, transform_indices = @transform_0, window_bounds = array<i64: 65, 32>}, {transform_indices = @transform_1, window_bounds = array<i64: 1, 32, 128>}, {transform_indices = @transform_2, window_bounds = array<i64: 1, 65, 128>}]} {
    %c0 = arith.constant 0 : index
    %c0_0 = arith.constant 0 : index
    %c0_1 = arith.constant 0 : index
    %0 = vector.load %arg3[%c0, %c0_0, %c0_1] : memref<1x32x128xf32, #tpu.memory_space<vmem>>, vector<1x32x128xf32>
    %1 = vector.shape_cast %0 : vector<1x32x128xf32> to vector<32x128xf32>
    %c0_2 = arith.constant 0 : index
    %c0_3 = arith.constant 0 : index
    %2 = vector.load %arg2[%c0_2, %c0_3] : memref<65x32xf32, #tpu.memory_space<vmem>>, vector<65x32xf32>
    %cst = arith.constant dense<0.000000e+00> : vector<65x128xf32>
    %3 = tpu.matmul %2, %1, %cst {dimension_numbers = #tpu.dot_dimension_numbers<[1], [0], [0], [1], [0, 0, 1, 1], [], []>} : vector<65x32xf32>, vector<32x128xf32>, vector<65x128xf32> -> vector<65x128xf32>
    %c0_4 = arith.constant 0 : index
    %c0_5 = arith.constant 0 : index
    %c0_6 = arith.constant 0 : index
    %4 = vector.load %arg4[%c0_4, %c0_5, %c0_6] : memref<1x65x128xf32, #tpu.memory_space<vmem>>, vector<1x65x128xf32>
    %5 = vector.shape_cast %4 : vector<1x65x128xf32> to vector<65x128xf32>
    %6 = vector.shape_cast %3 : vector<65x128xf32> to vector<1x65x128xf32>
    tpu.vector_store %arg4[%c0_4, %c0_5, %c0_6], %6 {strides = array<i32>} : memref<1x65x128xf32, #tpu.memory_space<vmem>>, vector<1x65x128xf32>,
    return
  }
  func.func @transform_0(%arg0: i32, %arg1: i32) -> (i32, i32) {
    %c0_i32 = arith.constant 0 : i32
    %c0_i32_0 = arith.constant 0 : i32
    %c0_i32_1 = arith.constant 0 : i32
    return %c0_i32, %c0_i32_0 : i32, i32
  }
  func.func @transform_1(%arg0: i32, %arg1: i32) -> (i32, i32, i32) {
    %c0_i32 = arith.constant 0 : i32
    %c0_i32_0 = arith.constant 0 : i32
    return %arg0, %c0_i32, %arg1 : i32, i32, i32
  }
  func.func @transform_2(%arg0: i32, %arg1: i32) -> (i32, i32, i32) {
    %c0_i32 = arith.constant 0 : i32
    %c0_i32_0 = arith.constant 0 : i32
    return %arg0, %c0_i32, %arg1 : i32, i32, i32
  }
}

</mosaic_0001>

<bundles_post_ra>
// kernel: tpu_custom_call.1
= control target key start
LH: loop header
LB: loop body
LE: loop exit
PB: predicated region body
PF: predicated region fallthrough
CT: control target
= control target key end

     0   :  { %s566_s9 = smov 0   ;;  %s568_s10 = smov 0   ;;  %s648_s0 = inlined_call_operand.vmem [shape: f32[65,32], index: 0, kind: input, shape index: {}]   ;;  %s649_s1 = inlined_call_operand.vmem [shape: f32[2,32,16], index: 1, kind: input, shape index: {}]   ;;  %s650_s2 = inlined_call_operand.vmem [shape: f32[2,65,16], index: 2, kind: output, shape index: {}]  }
   0x1   :  { %s570_s11 = smov 0  }
   0x2 LB: > { %s24_s12 = sadd.s32 1, %s542_s10  ;;  %p422_p0 = scmp.ge.s32.totalorder %s546_s11, 1  ;;  %s546_s11 = sphi %s570_s11, %s12_s11   ;;  %s542_s10 = sphi %s568_s10, %s652_s10   ;;  %s538_s9 = sphi %s566_s9, %s651_s9  }
   0x3   : > { %p26_p1 = scmp.ge.s32.totalorder %s24_s12, 2  ;;  %p131_p2 = scmp.lt.s32.totalorder %s546_s11, 3 }
   0x5   : > { %s654_s12 = smov (%p26_p1, %s24_s12), 0  ;;  %p132_p3 = pnand %p422_p0, %p131_p2 }
   0x6   : > { %p159_p4 = scmp.lt.s32.totalorder (!%p132_p3), %s538_s9, 1  ;;  %v548_v0 = vmov (!%p132_p3), 0.0|0.0   ;;  %vm549_vm0 = vmmov (!%p132_p3), 0   ;;  %v550_v1 = vmov (!%p132_p3), 0.0   ;;  %v179_v8 = vld [vmem:[%s648_s0] sm:$0xff] (!%p132_p3)  ;;  %vm188_vm1 = vcmask (!%p132_p3), 261120  }
   0x7   : > { %135 = sbr.rel (%p132_p3) target bundleno = 256 (0x100), region = 28  ;;  %486 = vmatprep.subr.bf16.mxu0 (!%p132_p3), %v548_v0  ;;  %492 = vmatprep.subr.bf16.mxu1 (!%p132_p3), %v548_v0  ;;  %v184_v9 = vld [vmem:[%s648_s0 + $0x28] sm:$0xff] (!%p132_p3)  ;;  %v185_v11 = vld [vmem:[%s648_s0 + $0x30] sm:$0xff] (!%p132_p3)  ;;  %v186_v13 = vld [vmem:[%s648_s0 + $0x38] sm:$0xff] (!%p132_p3) }
   0x8   : > { %459 = vmatprep.mubr.msk.f32.mxu0 (!%p132_p3), %vm549_vm0, %v550_v1  ;;  %474 = vmatprep.mubr.msk.f32.mxu1 (!%p132_p3), %vm549_vm0, %v550_v1  ;;  %v180_v10 = vld [vmem:[%s648_s0 + $0x8] sm:$0xff] (!%p132_p3)  ;;  %v181_v12 = vld [vmem:[%s648_s0 + $0x10] sm:$0xff] (!%p132_p3)  ;;  %v182_v14 = vld [vmem:[%s648_s0 + $0x18] sm:$0xff] (!%p132_p3) }
   0x9   : > { %v187_v15 = vld [vmem:[%s648_s0 + $0x40] sm:$0x1] (!%p132_p3) }
   0xa   : > { %v183_v16 = vld [vmem:[%s648_s0 + $0x20] sm:$0xff] (!%p132_p3) }
   0xe   : > { %s656_s9 = smov (!%p159_p4, %s538_s9), 1 }
   0xf   : > { %s437_s13 = sshll.u32 %s656_s9, 5  ;;  %s496_s7 = smul.u32 72, %s656_s9 }
  0x10   : > { %s166_s16 = scalar_lea.vmem %s649_s1, %s437_s13 }
  0x11   : > { %v175_v2 = vld [vmem:[%s166_s16] sm:$0xff]  ;;  %v176_v3 = vld [vmem:[%s166_s16 + $0x8] sm:$0xff]  ;;  %v177_v4 = vld [vmem:[%s166_s16 + $0x10] sm:$0xff]  ;;  %s174_s14 = scalar_lea.vmem %s650_s2, %s496_s7 }
  0x12   : > { %v487_v5 = vpack.c.bf16 %v176_v3, %v175_v2  ;;  %v178_v6 = vld [vmem:[%s166_s16 + $0x18] sm:$0xff] }
  0x13   : > { %v490_v7 = vpack.c.bf16 %v178_v6, %v177_v4 }
  0x14   : > { %488 = vmatpush3.bf16.msra.mxu0 %v487_v5  ;;  %494 = vmatpush3.bf16.msra.mxu1 %v487_v5 }
  0x15   : > { %489 = vmatprep.subr.bf16.mxu0 %v548_v0  ;;  %493 = vmatprep.subr.bf16.mxu1 %v548_v0 }
  0x18   : > { %491 = vmatpush3.bf16.msra.mxu0 %v490_v7  ;;  %495 = vmatpush3.bf16.msra.mxu1 %v490_v7 }
  0x1b   : > { %460 = vmatmul.mubr.msk.f32.vlgmr.msra.gmra.mrb[0].mxu0 %vm188_vm1, %v179_v8  ;;  %475 = vmatmul.mubr.msk.f32.vlgmr.msra.gmra.mrb[0].mxu1 %vm188_vm1, %v184_v9 }
  0x1c   : > { %462 = vmatprep.mubr.msk.f32.mxu0 %vm549_vm0, %v550_v1  ;;  %477 = vmatprep.mubr.msk.f32.mxu1 %vm549_vm0, %v550_v1 }
  0x1f   : > { %463 = vmatmul.mubr.msk.f32.gmra.mrb[2].mxu0 %vm188_vm1, %v180_v10  ;;  %478 = vmatmul.mubr.msk.f32.gmra.mrb[2].mxu1 %vm188_vm1, %v185_v11 }
  0x20   : > { %465 = vmatprep.mubr.msk.f32.mxu0 %vm549_vm0, %v550_v1  ;;  %480 = vmatprep.mubr.msk.f32.mxu1 %vm549_vm0, %v550_v1 }
  0x23   : > { %466 = vmatmul.mubr.msk.f32.gmra.mrb[4].mxu0 %vm188_vm1, %v181_v12  ;;  %481 = vmatmul.mubr.msk.f32.gmra.mrb[4].mxu1 %vm188_vm1, %v186_v13 }
  0x24   : > { %468 = vmatprep.mubr.msk.f32.mxu0 %vm549_vm0, %v550_v1  ;;  %483 = vmatprep.mubr.msk.f32.mxu1 %vm549_vm0, %v550_v1 }
  0x27   : > { %469 = vmatmul.mubr.msk.f32.gmra.mrb[6].mxu0 %vm188_vm1, %v182_v14  ;;  %484 = vmatmul.mubr.msk.f32.gmra.mrb[6].mxu1 %vm188_vm1, %v187_v15 }
  0x28   : > { %471 = vmatprep.mubr.msk.f32.mxu0 %vm549_vm0, %v550_v1 }
  0x2b   : > { %472 = vmatmul.mubr.msk.f32.gmra.mrb[8].mxu0 %vm188_vm1, %v183_v16 }
  0xee   : > { %v282_v17 = vpop.f32.mrb[0].mxu0  ;;  %v307_v18 = vpop.f32.mrb[0].mxu1 }
  0xef   : > { %326 = vst [vmem:[%s174_s14] sm:$0xff] %v282_v17  ;;  %v461_v19 = vpop.f32.mrb[1].mxu0  ;;  %331 = vst [vmem:[%s174_s14 + $0x28] sm:$0xff] %v307_v18  ;;  %v476_v20 = vpop.f32.mrb[1].mxu1 }
  0xf2   : > { %v287_v21 = vpop.f32.mrb[2].mxu0  ;;  %v312_v22 = vpop.f32.mrb[2].mxu1 }
  0xf3   : > { %327 = vst [vmem:[%s174_s14 + $0x8] sm:$0xff] %v287_v21  ;;  %v464_v23 = vpop.f32.mrb[3].mxu0  ;;  %332 = vst [vmem:[%s174_s14 + $0x30] sm:$0xff] %v312_v22  ;;  %v479_v24 = vpop.f32.mrb[3].mxu1 }
  0xf6   : > { %v292_v25 = vpop.f32.mrb[4].mxu0  ;;  %v317_v26 = vpop.f32.mrb[4].mxu1 }
  0xf7   : > { %328 = vst [vmem:[%s174_s14 + $0x10] sm:$0xff] %v292_v25  ;;  %v467_v27 = vpop.f32.mrb[5].mxu0  ;;  %333 = vst [vmem:[%s174_s14 + $0x38] sm:$0xff] %v317_v26  ;;  %v482_v28 = vpop.f32.mrb[5].mxu1 }
  0xfa   : > { %v297_v29 = vpop.f32.mrb[6].mxu0  ;;  %v322_v30 = vpop.f32.mrb[6].mxu1 }
  0xfb   : > { %329 = vst [vmem:[%s174_s14 + $0x18] sm:$0xff] %v297_v29  ;;  %v470_v31 = vpop.f32.mrb[7].mxu0  ;;  %334 = vst [vmem:[%s174_s14 + $0x40] sm:$0x1] %v322_v30  ;;  %v485_v32 = vpop.f32.mrb[7].mxu1 }
  0xfe   : > { %v302_v33 = vpop.f32.mrb[8].mxu0 }
  0xff   : > { %330 = vst [vmem:[%s174_s14 + $0x20] sm:$0xff] %v302_v33  ;;  %v473_v34 = vpop.f32.mrb[9].mxu0 }
 0x100 PF: > { %s12_s11 = sadd.s32 1, %s546_s11   ;;  %s651_s9 = smov %s542_s10 }
 0x101   : > { %p9_p5 = scmp.ge.s32.totalorder %s12_s11, 4   ;;  %s652_s10 = smov %s654_s12 }
 0x103   :  { %11 = sbr.rel (!%p9_p5) target bundleno = 2 (0x2), region = 58 }

</bundles_post_ra>
